<compile_context>
chip_gen: v6e
topology: v6e:2x2x1
jax: 0.10.0
libtpu: 0.0.40
codegen_flags: <defaults>
</compile_context>

<pallas_src>
import functools

import jax
import jax.numpy as jnp
from jax.experimental import pallas as pl
from jax.experimental.pallas import tpu as pltpu


def _round_up(x, m):
    return (x + m - 1) // m * m


def _largest_divisor_leq(n, k):
    k = max(1, min(n, k))
    while n % k:
        k -= 1
    return k


# ----------------------------------------------------------------------------
# Kernel 1: fused LeakyReLU + stride-2 4x4 conv (4 shifted MXU matmuls) + bias
#           + per-tile BatchNorm partial statistics.
# ----------------------------------------------------------------------------
def _conv_stats_kernel(s_main_ref, s_halo_ref, w2_ref, b_ref,
                       y_ref, stats_ref, *, slope):
    th = s_main_ref.shape[1]
    Wp = s_main_ref.shape[2]
    C4 = s_main_ref.shape[3]
    Wo = Wp - 1
    cout_p = y_ref.shape[3]

    # Assemble the (th + 1)-row input stripe and apply LeakyReLU once.
    s = jnp.concatenate([s_main_ref[0], s_halo_ref[0]], axis=0)   # [th+1, Wp, C4]
    s = jnp.where(s >= 0, s, slope * s)

    # Four taps of the space-to-depth conv, accumulated in f32 on the MXU.
    acc = None
    for t, (dh, dw) in enumerate(((0, 0), (0, 1), (1, 0), (1, 1))):
        a = s[dh:dh + th, dw:dw + Wo, :].reshape(th * Wo, C4)
        p = jnp.dot(a, w2_ref[t], preferred_element_type=jnp.float32)
        acc = p if acc is None else acc + p
    acc = acc + b_ref[...]                                         # [1, cout_p] bcast

    # Pre-BN activations stored in bf16 (halves inter-pass HBM traffic);
    # statistics are taken from the exact f32 accumulator.
    y_ref[0] = acc.reshape(th, Wo, cout_p).astype(y_ref.dtype)
    stats_ref[0, 0, 0:1, :] = jnp.sum(acc, axis=0, keepdims=True)
    stats_ref[0, 0, 1:2, :] = jnp.sum(acc * acc, axis=0, keepdims=True)


# ----------------------------------------------------------------------------
# Kernel 2: BatchNorm affine normalization (per-channel scale/shift hoisted).
# ----------------------------------------------------------------------------
def _bn_affine_kernel(y_ref, scale_ref, shift_ref, o_ref):
    # bf16 * f32 promotes to f32; output written lane-dense in f32.
    o_ref[0] = (y_ref[0] * scale_ref[...] + shift_ref[...]).astype(o_ref.dtype)


# ----------------------------------------------------------------------------
# Wrapper
# ----------------------------------------------------------------------------
def conv_block_forward(x, w, b, gamma, beta, *, eps=1e-5, slope=0.2,
                       compute_dtype=jnp.bfloat16):
    """x: [N, Cin, H, W] f32 (NCHW).  w: [Cout, Cin, 4, 4].  Returns NCHW f32."""
    N, Cin, H, W = x.shape
    Cout, Cin_w, KH, KW = w.shape
    assert (KH, KW) == (4, 4) and Cin_w == Cin
    assert H % 2 == 0 and W % 2 == 0, "stride-2 k=4 p=1 block expects even H, W"
    Ho, Wo = H // 2, W // 2
    Hp, Wp = Ho + 1, Wo + 1
    C4 = 4 * Cin
    cout_p = _round_up(Cout, 128)     # lane-dense output channels

    # --- layout glue (single pass over x): NCHW -> padded NHWC -> space-to-depth
    # s2d[n, r, q, (p*2+s)*Cin + ci] = xpad[n, ci, 2r+p, 2q+s]
    xh = jnp.transpose(x, (0, 2, 3, 1))
    xpad = jnp.pad(xh, ((0, 0), (1, 1), (1, 1), (0, 0)))
    s2d = (xpad.reshape(N, Hp, 2, Wp, 2, Cin)
                .transpose(0, 1, 3, 2, 4, 5)
                .reshape(N, Hp, Wp, C4)
                .astype(compute_dtype))

    # --- weights: w[co, ci, 2dh+p, 2dw+s] -> W2[2dh+dw, (p*2+s)*Cin+ci, co]
    w2 = (w.reshape(Cout, Cin, 2, 2, 2, 2)
            .transpose(2, 4, 3, 5, 1, 0)
            .reshape(4, C4, Cout))
    w2 = jnp.pad(w2, ((0, 0), (0, 0), (0, cout_p - Cout))).astype(compute_dtype)
    b2 = jnp.pad(b.astype(jnp.float32), (0, cout_p - Cout)).reshape(1, cout_p)

    # --- row-tile size from a VMEM budget (v7x 64 MiB physical -> stay <= 40 MiB)
    in_isz = jnp.dtype(compute_dtype).itemsize

    def tile_bytes(t):
        a_in = 2 * t * Wp * C4 * in_isz                 # double-buffered stripe
        halo = 2 * Wp * C4 * in_isz
        wgt = 2 * 4 * C4 * cout_p * in_isz
        outs = 2 * t * Wo * cout_p * 2 + 2 * 2 * cout_p * 4     # bf16 y + f32 stats
        live = (t + 1) * Wp * C4 * 4 + 2 * t * Wo * cout_p * 4  # in-kernel temps
        return a_in + halo + wgt + outs + live

    th = _largest_divisor_leq(Ho, max(1, 512 // max(Wo, 1)))
    while th > 1 and tile_bytes(th) > 40 * 2**20:
        th = _largest_divisor_leq(Ho, th - 1)
    n_i = Ho // th
    vmem_limit = int(min(48 * 2**20, max(16 * 2**20, 2 * tile_bytes(th))))
    grid = (N, n_i)

    # --- Pallas pass 1: conv + fused activation + fused BN partial stats -----
    y4, stats = pl.pallas_call(
        functools.partial(_conv_stats_kernel, slope=slope),
        out_shape=(jax.ShapeDtypeStruct((N, Ho, Wo, cout_p), compute_dtype),
                   jax.ShapeDtypeStruct((N, n_i, 2, cout_p), jnp.float32)),
        grid=grid,
        in_specs=[
            pl.BlockSpec((1, th, Wp, C4), lambda n, i: (n, i, 0, 0)),
            pl.BlockSpec((1, 1, Wp, C4), lambda n, i: (n, i * th + th, 0, 0)),
            pl.BlockSpec((4, C4, cout_p), lambda n, i: (0, 0, 0)),
            pl.BlockSpec((1, cout_p), lambda n, i: (0, 0)),
        ],
        out_specs=(
            pl.BlockSpec((1, th, Wo, cout_p), lambda n, i: (n, i, 0, 0)),
            pl.BlockSpec((1, 1, 2, cout_p), lambda n, i: (n, i, 0, 0)),
        ),
        compiler_params=pltpu.CompilerParams(
            dimension_semantics=("parallel", "parallel"),
            vmem_limit_bytes=vmem_limit),
    )(s2d, s2d, w2, b2)

    # --- tiny per-channel reduction + hoisted rsqrt (negligible glue) --------
    m = N * Ho * Wo
    s1 = jnp.sum(stats[:, :, 0, :], axis=(0, 1))
    s2 = jnp.sum(stats[:, :, 1, :], axis=(0, 1))
    mean = s1 / m
    var = jnp.maximum(s2 / m - mean * mean, 0.0)       # biased var (PyTorch BN)
    inv = jax.lax.rsqrt(var + eps)
    gamma_p = jnp.pad(gamma.astype(jnp.float32), (0, cout_p - Cout))
    beta_p = jnp.pad(beta.astype(jnp.float32), (0, cout_p - Cout))
    scale = (gamma_p * inv).reshape(1, cout_p)
    shift = (beta_p - mean * gamma_p * inv).reshape(1, cout_p)

    # --- Pallas pass 2: tiled BN affine (bf16 read, f32 lane-dense write) ----
    z4 = pl.pallas_call(
        _bn_affine_kernel,
        out_shape=jax.ShapeDtypeStruct((N, Ho, Wo, cout_p), jnp.float32),
        grid=grid,
        in_specs=[
            pl.BlockSpec((1, th, Wo, cout_p), lambda n, i: (n, i, 0, 0)),
            pl.BlockSpec((1, cout_p), lambda n, i: (0, 0)),
            pl.BlockSpec((1, cout_p), lambda n, i: (0, 0)),
        ],
        out_specs=pl.BlockSpec((1, th, Wo, cout_p), lambda n, i: (n, i, 0, 0)),
        compiler_params=pltpu.CompilerParams(
            dimension_semantics=("parallel", "parallel"),
            vmem_limit_bytes=vmem_limit),
    )(y4, scale, shift)

    # TODO(synk): keep NHWC end-to-end in the surrounding network to drop these
    # boundary transposes (kept here only to preserve the PyTorch NCHW contract).
    return jnp.transpose(z4[:, :, :, :Cout], (0, 3, 1, 2))


# ----------------------------------------------------------------------------
# Pure-JAX reference (f32, HIGHEST precision) for the sanity check
# ----------------------------------------------------------------------------
def _reference(x, w, b, gamma, beta, eps=1e-5):
    xa = jnp.where(x >= 0, x, 0.2 * x)
    y = jax.lax.conv_general_dilated(
        xa, w, window_strides=(2, 2), padding=((1, 1), (1, 1)),
        dimension_numbers=("NCHW", "OIHW", "NCHW"),
        precision=jax.lax.Precision.HIGHEST)
    y = y + b[None, :, None, None]
    mean = jnp.mean(y, axis=(0, 2, 3), keepdims=True)
    var = jnp.mean((y - mean) ** 2, axis=(0, 2, 3), keepdims=True)
    yhat = (y - mean) * jax.lax.rsqrt(var + eps)
    return yhat * gamma[None, :, None, None] + beta[None, :, None, None]


if __name__ == "__main__":
    key = jax.random.PRNGKey(0)
    kx, kw, kb, kg, kbt = jax.random.split(key, 5)

    N, Cin, H, W = 2, 4, 16, 16
    Cout = 8

    x = jax.random.normal(kx, (N, Cin, H, W), dtype=jnp.float32)
    w = jax.random.normal(kw, (Cout, Cin, 4, 4), dtype=jnp.float32) * 0.1
    b = jax.random.normal(kb, (Cout,), dtype=jnp.float32) * 0.1
    gamma = 1.0 + 0.1 * jax.random.normal(kg, (Cout,), dtype=jnp.float32)
    beta = 0.1 * jax.random.normal(kbt, (Cout,), dtype=jnp.float32)

    out = jax.jit(conv_block_forward)(x, w, b, gamma, beta)
    out = jax.block_until_ready(out)

    ref = _reference(x, w, b, gamma, beta)
    assert out.shape == (N, Cout, H // 2, W // 2), out.shape
    # Tolerance vs the f32 HIGHEST reference: conv uses bf16 MXU inputs with
    # f32 accumulation, and the pre-BN intermediate is stored in bf16 (stats
    # are exact f32), so allow a modest bf16-level error budget.
    max_err = float(jnp.max(jnp.abs(out - ref)))
    assert jnp.allclose(out, ref, atol=4e-2, rtol=4e-2), max_err

    print("KERNEL_OK")
</pallas_src>

<mosaic_0001>
module attributes {stable_mosaic.version = 11 : i64} {
  func.func @_conv_stats_kernel(%arg0: i32, %arg1: i32, %arg2: memref<1x8x9x16xbf16, #tpu.memory_space<vmem>>, %arg3: memref<1x1x9x16xbf16, #tpu.memory_space<vmem>>, %arg4: memref<4x16x128xbf16, #tpu.memory_space<vmem>>, %arg5: memref<1x128xf32, #tpu.memory_space<vmem>>, %arg6: memref<1x8x8x128xbf16, #tpu.memory_space<vmem>>, %arg7: memref<1x1x2x128xf32, #tpu.memory_space<vmem>>) attributes {dimension_semantics = [#tpu.dimension_semantics<parallel>, #tpu.dimension_semantics<parallel>], iteration_bounds = array<i64: 2, 1>, scalar_prefetch = 0 : i64, scratch_operands = 0 : i64, tpu.core_type = #tpu.core_type<tc>, window_params = [{transform_indices = @transform_0, window_bounds = array<i64: 1, 8, 9, 16>}, {transform_indices = @transform_1, window_bounds = array<i64: 1, 1, 9, 16>}, {pipeline_mode = #tpu.pipeline_mode<synchronous>, transform_indices = @transform_2, window_bounds = array<i64: 4, 16, 128>}, {pipeline_mode = #tpu.pipeline_mode<synchronous>, transform_indices = @transform_3, window_bounds = array<i64: 1, 128>}, {transform_indices = @transform_4, window_bounds = array<i64: 1, 8, 8, 128>}, {transform_indices = @transform_5, window_bounds = array<i64: 1, 1, 2, 128>}]} {
    %c0 = arith.constant 0 : index
    %c0_0 = arith.constant 0 : index
    %c0_1 = arith.constant 0 : index
    %c0_2 = arith.constant 0 : index
    %0 = vector.load %arg2[%c0, %c0_0, %c0_1, %c0_2] : memref<1x8x9x16xbf16, #tpu.memory_space<vmem>>, vector<1x8x9x16xbf16>
    %1 = vector.shape_cast %0 : vector<1x8x9x16xbf16> to vector<8x9x16xbf16>
    %c0_3 = arith.constant 0 : index
    %c0_4 = arith.constant 0 : index
    %c0_5 = arith.constant 0 : index
    %c0_6 = arith.constant 0 : index
    %2 = vector.load %arg3[%c0_3, %c0_4, %c0_5, %c0_6] : memref<1x1x9x16xbf16, #tpu.memory_space<vmem>>, vector<1x1x9x16xbf16>
    %3 = vector.shape_cast %2 : vector<1x1x9x16xbf16> to vector<1x9x16xbf16>
    %4 = tpu.concatenate %1, %3 in 0 : vector<8x9x16xbf16>, vector<1x9x16xbf16> -> vector<9x9x16xbf16>
    %cst = arith.constant 0.000000e+00 : bf16
    %5 = vector.broadcast %cst : bf16 to vector<9x9x16xbf16>
    %6 = arith.cmpf oge, %4, %5 : vector<9x9x16xbf16>
    %cst_7 = arith.constant 2.001950e-01 : bf16
    %7 = vector.broadcast %cst_7 : bf16 to vector<9x9x16xbf16>
    %8 = arith.mulf %7, %4 : vector<9x9x16xbf16>
    %9 = arith.select %6, %4, %8 : vector<9x9x16xi1>, vector<9x9x16xbf16>
    %10 = vector.extract_strided_slice %9 {offsets = [0, 0, 0], sizes = [8, 8, 16], strides = [1, 1, 1]} : vector<9x9x16xbf16> to vector<8x8x16xbf16>
    %11 = vector.shape_cast %10 : vector<8x8x16xbf16> to vector<64x16xbf16>
    %c0_8 = arith.constant 0 : index
    %c0_9 = arith.constant 0 : index
    %c0_10 = arith.constant 0 : index
    %12 = vector.load %arg4[%c0_8, %c0_9, %c0_10] : memref<4x16x128xbf16, #tpu.memory_space<vmem>>, vector<1x16x128xbf16>
    %13 = vector.shape_cast %12 : vector<1x16x128xbf16> to vector<16x128xbf16>
    %cst_11 = arith.constant dense<0.000000e+00> : vector<64x128xf32>
    %14 = tpu.matmul %11, %13, %cst_11 {dimension_numbers = #tpu.dot_dimension_numbers<[1], [0], [0], [1], [0, 0, 1, 1], [], []>} : vector<64x16xbf16>, vector<16x128xbf16>, vector<64x128xf32> -> vector<64x128xf32>
    %15 = vector.extract_strided_slice %9 {offsets = [0, 1, 0], sizes = [8, 8, 16], strides = [1, 1, 1]} : vector<9x9x16xbf16> to vector<8x8x16xbf16>
    %16 = vector.shape_cast %15 : vector<8x8x16xbf16> to vector<64x16xbf16>
    %c1 = arith.constant 1 : index
    %c0_12 = arith.constant 0 : index
    %c0_13 = arith.constant 0 : index
    %17 = vector.load %arg4[%c1, %c0_12, %c0_13] : memref<4x16x128xbf16, #tpu.memory_space<vmem>>, vector<1x16x128xbf16>
    %18 = vector.shape_cast %17 : vector<1x16x128xbf16> to vector<16x128xbf16>
    %cst_14 = arith.constant dense<0.000000e+00> : vector<64x128xf32>
    %19 = tpu.matmul %16, %18, %cst_14 {dimension_numbers = #tpu.dot_dimension_numbers<[1], [0], [0], [1], [0, 0, 1, 1], [], []>} : vector<64x16xbf16>, vector<16x128xbf16>, vector<64x128xf32> -> vector<64x128xf32>
    %20 = arith.addf %14, %19 : vector<64x128xf32>
    %21 = vector.extract_strided_slice %9 {offsets = [1, 0, 0], sizes = [8, 8, 16], strides = [1, 1, 1]} : vector<9x9x16xbf16> to vector<8x8x16xbf16>
    %22 = vector.shape_cast %21 : vector<8x8x16xbf16> to vector<64x16xbf16>
    %c2 = arith.constant 2 : index
    %c0_15 = arith.constant 0 : index
    %c0_16 = arith.constant 0 : index
    %23 = vector.load %arg4[%c2, %c0_15, %c0_16] : memref<4x16x128xbf16, #tpu.memory_space<vmem>>, vector<1x16x128xbf16>
    %24 = vector.shape_cast %23 : vector<1x16x128xbf16> to vector<16x128xbf16>
    %cst_17 = arith.constant dense<0.000000e+00> : vector<64x128xf32>
    %25 = tpu.matmul %22, %24, %cst_17 {dimension_numbers = #tpu.dot_dimension_numbers<[1], [0], [0], [1], [0, 0, 1, 1], [], []>} : vector<64x16xbf16>, vector<16x128xbf16>, vector<64x128xf32> -> vector<64x128xf32>
    %26 = arith.addf %20, %25 : vector<64x128xf32>
    %27 = vector.extract_strided_slice %9 {offsets = [1, 1, 0], sizes = [8, 8, 16], strides = [1, 1, 1]} : vector<9x9x16xbf16> to vector<8x8x16xbf16>
    %28 = vector.shape_cast %27 : vector<8x8x16xbf16> to vector<64x16xbf16>
    %c3 = arith.constant 3 : index
    %c0_18 = arith.constant 0 : index
    %c0_19 = arith.constant 0 : index
    %29 = vector.load %arg4[%c3, %c0_18, %c0_19] : memref<4x16x128xbf16, #tpu.memory_space<vmem>>, vector<1x16x128xbf16>
    %30 = vector.shape_cast %29 : vector<1x16x128xbf16> to vector<16x128xbf16>
    %cst_20 = arith.constant dense<0.000000e+00> : vector<64x128xf32>
    %31 = tpu.matmul %28, %30, %cst_20 {dimension_numbers = #tpu.dot_dimension_numbers<[1], [0], [0], [1], [0, 0, 1, 1], [], []>} : vector<64x16xbf16>, vector<16x128xbf16>, vector<64x128xf32> -> vector<64x128xf32>
    %32 = arith.addf %26, %31 : vector<64x128xf32>
    %c0_21 = arith.constant 0 : index
    %c0_22 = arith.constant 0 : index
    %33 = vector.load %arg5[%c0_21, %c0_22] : memref<1x128xf32, #tpu.memory_space<vmem>>, vector<1x128xf32>
    %34 = vector.broadcast %33 : vector<1x128xf32> to vector<64x128xf32>
    %35 = arith.addf %32, %34 : vector<64x128xf32>
    %36 = vector.shape_cast %35 : vector<64x128xf32> to vector<8x8x128xf32>
    %37 = arith.truncf %36 : vector<8x8x128xf32> to vector<8x8x128xbf16>
    %c0_23 = arith.constant 0 : index
    %c0_24 = arith.constant 0 : index
    %c0_25 = arith.constant 0 : index
    %c0_26 = arith.constant 0 : index
    %38 = vector.load %arg6[%c0_23, %c0_24, %c0_25, %c0_26] : memref<1x8x8x128xbf16, #tpu.memory_space<vmem>>, vector<1x8x8x128xbf16>
    %39 = vector.shape_cast %38 : vector<1x8x8x128xbf16> to vector<8x8x128xbf16>
    %40 = vector.shape_cast %37 : vector<8x8x128xbf16> to vector<1x8x8x128xbf16>
    tpu.vector_store %arg6[%c0_23, %c0_24, %c0_25, %c0_26], %40 {strides = array<i32>} : memref<1x8x8x128xbf16, #tpu.memory_space<vmem>>, vector<1x8x8x128xbf16>,
    %cst_27 = arith.constant dense<0.000000e+00> : vector<128xf32>
    %41 = vector.multi_reduction <add>, %35, %cst_27 [0] : vector<64x128xf32> to vector<128xf32>
    %42 = vector.shape_cast %41 : vector<128xf32> to vector<1x128xf32>
    %c0_28 = arith.constant 0 : index
    %c0_29 = arith.constant 0 : index
    %c0_30 = arith.constant 0 : index
    %c0_31 = arith.constant 0 : index
    %43 = vector.load %arg7[%c0_28, %c0_29, %c0_30, %c0_31] : memref<1x1x2x128xf32, #tpu.memory_space<vmem>>, vector<1x1x1x128xf32>
    %44 = vector.shape_cast %43 : vector<1x1x1x128xf32> to vector<1x128xf32>
    %45 = vector.shape_cast %42 : vector<1x128xf32> to vector<1x1x1x128xf32>
    tpu.vector_store %arg7[%c0_28, %c0_29, %c0_30, %c0_31], %45 {strides = array<i32>} : memref<1x1x2x128xf32, #tpu.memory_space<vmem>>, vector<1x1x1x128xf32>,
    %46 = arith.mulf %35, %35 : vector<64x128xf32>
    %cst_32 = arith.constant dense<0.000000e+00> : vector<128xf32>
    %47 = vector.multi_reduction <add>, %46, %cst_32 [0] : vector<64x128xf32> to vector<128xf32>
    %48 = vector.shape_cast %47 : vector<128xf32> to vector<1x128xf32>
    %c0_33 = arith.constant 0 : index
    %c0_34 = arith.constant 0 : index
    %c1_35 = arith.constant 1 : index
    %c0_36 = arith.constant 0 : index
    %49 = vector.load %arg7[%c0_33, %c0_34, %c1_35, %c0_36] : memref<1x1x2x128xf32, #tpu.memory_space<vmem>>, vector<1x1x1x128xf32>
    %50 = vector.shape_cast %49 : vector<1x1x1x128xf32> to vector<1x128xf32>
    %51 = vector.shape_cast %48 : vector<1x128xf32> to vector<1x1x1x128xf32>
    tpu.vector_store %arg7[%c0_33, %c0_34, %c1_35, %c0_36], %51 {strides = array<i32>} : memref<1x1x2x128xf32, #tpu.memory_space<vmem>>, vector<1x1x1x128xf32>,
    return
  }
  func.func @transform_0(%arg0: i32, %arg1: i32) -> (i32, i32, i32, i32) {
    %c0_i32 = arith.constant 0 : i32
    %c0_i32_0 = arith.constant 0 : i32
    %c0_i32_1 = arith.constant 0 : i32
    return %arg0, %arg1, %c0_i32, %c0_i32_0 : i32, i32, i32, i32
  }
  func.func @transform_1(%arg0: i32, %arg1: i32) -> (i32, i32, i32, i32) {
    %c8_i32 = arith.constant 8 : i32
    %0 = arith.muli %arg1, %c8_i32 : i32
    %c8_i32_0 = arith.constant 8 : i32
    %1 = arith.addi %0, %c8_i32_0 : i32
    %c0_i32 = arith.constant 0 : i32
    %c0_i32_1 = arith.constant 0 : i32
    %c0_i32_2 = arith.constant 0 : i32
    return %arg0, %1, %c0_i32, %c0_i32_1 : i32, i32, i32, i32
  }
  func.func @transform_2(%arg0: i32, %arg1: i32) -> (i32, i32, i32) {
    %c0_i32 = arith.constant 0 : i32
    %c0_i32_0 = arith.constant 0 : i32
    %c0_i32_1 = arith.constant 0 : i32
    %c0_i32_2 = arith.constant 0 : i32
    return %c0_i32, %c0_i32_0, %c0_i32_1 : i32, i32, i32
  }
  func.func @transform_3(%arg0: i32, %arg1: i32) -> (i32, i32) {
    %c0_i32 = arith.constant 0 : i32
    %c0_i32_0 = arith.constant 0 : i32
    %c0_i32_1 = arith.constant 0 : i32
    return %c0_i32, %c0_i32_0 : i32, i32
  }
  func.func @transform_4(%arg0: i32, %arg1: i32) -> (i32, i32, i32, i32) {
    %c0_i32 = arith.constant 0 : i32
    %c0_i32_0 = arith.constant 0 : i32
    %c0_i32_1 = arith.constant 0 : i32
    return %arg0, %arg1, %c0_i32, %c0_i32_0 : i32, i32, i32, i32
  }
  func.func @transform_5(%arg0: i32, %arg1: i32) -> (i32, i32, i32, i32) {
    %c0_i32 = arith.constant 0 : i32
    %c0_i32_0 = arith.constant 0 : i32
    %c0_i32_1 = arith.constant 0 : i32
    return %arg0, %arg1, %c0_i32, %c0_i32_0 : i32, i32, i32, i32
  }
}

module attributes {stable_mosaic.version = 11 : i64} {
  func.func @_bn_affine_kernel(%arg0: i32, %arg1: i32, %arg2: memref<1x8x8x128xbf16, #tpu.memory_space<vmem>>, %arg3: memref<1x128xf32, #tpu.memory_space<vmem>>, %arg4: memref<1x128xf32, #tpu.memory_space<vmem>>, %arg5: memref<1x8x8x128xf32, #tpu.memory_space<vmem>>) attributes {dimension_semantics = [#tpu.dimension_semantics<parallel>, #tpu.dimension_semantics<parallel>], iteration_bounds = array<i64: 2, 1>, scalar_prefetch = 0 : i64, scratch_operands = 0 : i64, tpu.core_type = #tpu.core_type<tc>, window_params = [{transform_indices = @transform_0, window_bounds = array<i64: 1, 8, 8, 128>}, {pipeline_mode = #tpu.pipeline_mode<synchronous>, transform_indices = @transform_1, window_bounds = array<i64: 1, 128>}, {pipeline_mode = #tpu.pipeline_mode<synchronous>, transform_indices = @transform_2, window_bounds = array<i64: 1, 128>}, {transform_indices = @transform_3, window_bounds = array<i64: 1, 8, 8, 128>}]} {
    %c0 = arith.constant 0 : index
    %c0_0 = arith.constant 0 : index
    %c0_1 = arith.constant 0 : index
    %c0_2 = arith.constant 0 : index
    %0 = vector.load %arg2[%c0, %c0_0, %c0_1, %c0_2] : memref<1x8x8x128xbf16, #tpu.memory_space<vmem>>, vector<1x8x8x128xbf16>
    %1 = vector.shape_cast %0 : vector<1x8x8x128xbf16> to vector<8x8x128xbf16>
    %c0_3 = arith.constant 0 : index
    %c0_4 = arith.constant 0 : index
    %2 = vector.load %arg3[%c0_3, %c0_4] : memref<1x128xf32, #tpu.memory_space<vmem>>, vector<1x128xf32>
    %3 = arith.extf %1 : vector<8x8x128xbf16> to vector<8x8x128xf32>
    %4 = vector.shape_cast %2 : vector<1x128xf32> to vector<1x1x128xf32>
    %5 = vector.broadcast %4 : vector<1x1x128xf32> to vector<8x8x128xf32>
    %6 = arith.mulf %3, %5 : vector<8x8x128xf32>
    %c0_5 = arith.constant 0 : index
    %c0_6 = arith.constant 0 : index
    %7 = vector.load %arg4[%c0_5, %c0_6] : memref<1x128xf32, #tpu.memory_space<vmem>>, vector<1x128xf32>
    %8 = vector.shape_cast %7 : vector<1x128xf32> to vector<1x1x128xf32>
    %9 = vector.broadcast %8 : vector<1x1x128xf32> to vector<8x8x128xf32>
    %10 = arith.addf %6, %9 : vector<8x8x128xf32>
    %c0_7 = arith.constant 0 : index
    %c0_8 = arith.constant 0 : index
    %c0_9 = arith.constant 0 : index
    %c0_10 = arith.constant 0 : index
    %11 = vector.load %arg5[%c0_7, %c0_8, %c0_9, %c0_10] : memref<1x8x8x128xf32, #tpu.memory_space<vmem>>, vector<1x8x8x128xf32>
    %12 = vector.shape_cast %11 : vector<1x8x8x128xf32> to vector<8x8x128xf32>
    %13 = vector.shape_cast %10 : vector<8x8x128xf32> to vector<1x8x8x128xf32>
    tpu.vector_store %arg5[%c0_7, %c0_8, %c0_9, %c0_10], %13 {strides = array<i32>} : memref<1x8x8x128xf32, #tpu.memory_space<vmem>>, vector<1x8x8x128xf32>,
    return
  }
  func.func @transform_0(%arg0: i32, %arg1: i32) -> (i32, i32, i32, i32) {
    %c0_i32 = arith.constant 0 : i32
    %c0_i32_0 = arith.constant 0 : i32
    %c0_i32_1 = arith.constant 0 : i32
    return %arg0, %arg1, %c0_i32, %c0_i32_0 : i32, i32, i32, i32
  }
  func.func @transform_1(%arg0: i32, %arg1: i32) -> (i32, i32) {
    %c0_i32 = arith.constant 0 : i32
    %c0_i32_0 = arith.constant 0 : i32
    %c0_i32_1 = arith.constant 0 : i32
    return %c0_i32, %c0_i32_0 : i32, i32
  }
  func.func @transform_2(%arg0: i32, %arg1: i32) -> (i32, i32) {
    %c0_i32 = arith.constant 0 : i32
    %c0_i32_0 = arith.constant 0 : i32
    %c0_i32_1 = arith.constant 0 : i32
    return %c0_i32, %c0_i32_0 : i32, i32
  }
  func.func @transform_3(%arg0: i32, %arg1: i32) -> (i32, i32, i32, i32) {
    %c0_i32 = arith.constant 0 : i32
    %c0_i32_0 = arith.constant 0 : i32
    %c0_i32_1 = arith.constant 0 : i32
    return %arg0, %arg1, %c0_i32, %c0_i32_0 : i32, i32, i32, i32
  }
}

</mosaic_0001>

<bundles_post_ra>
// kernel: conv_block_forward.3
= control target key start
LH: loop header
LB: loop body
LE: loop exit
PB: predicated region body
PF: predicated region fallthrough
CT: control target
= control target key end

     0   :  { %s453_s12 = smov 0   ;;  %s455_s13 = smov 0   ;;  %s492_s0 = inlined_call_operand.vmem [shape: bf16[2,8,8,128], index: 0, kind: input, shape index: {}]   ;;  %s493_s1 = inlined_call_operand.vmem [shape: f32[1,128], index: 1, kind: input, shape index: {}]   ;;  %s494_s2 = inlined_call_operand.vmem [shape: f32[1,128], index: 2, kind: input, shape index: {}]   ;;  %s495_s3 = inlined_call_operand.vmem [shape: f32[2,8,8,128], index: 3, kind: output, shape index: {}]  }
   0x1   :  { %s457_s14 = smov 0  }
   0x2 LB: > { %s25_s15 = sadd.s32 1, %s427_s13  ;;  %p355_p0 = scmp.ge.s32.totalorder %s431_s14, 1  ;;  %s431_s14 = sphi %s457_s14, %s13_s14   ;;  %s427_s13 = sphi %s455_s13, %s497_s13   ;;  %s423_s12 = sphi %s453_s12, %s496_s12  }
   0x3   : > { %p27_p1 = scmp.ge.s32.totalorder %s25_s15, 2  ;;  %p158_p2 = scmp.lt.s32.totalorder %s431_s14, 3 }
   0x5   : > { %s499_s15 = smov (%p27_p1, %s25_s15), 0  ;;  %p159_p3 = pnand %p355_p0, %p158_p2 }
   0x6   : > { %p191_p4 = scmp.lt.s32.totalorder (!%p159_p3), %s423_s12, 1 }
   0x7   : > { %162 = sbr.rel (%p159_p3) target bundleno = 26 (0x1a), region = 32 }
   0xc   : > { %s501_s12 = smov (!%p191_p4, %s423_s12), 1  ;;  %v360_v0 = vld [vmem:[%s493_s1] ss:$0 sm:$0xff] }
   0xd   : > { %s364_s16 = sshll.u32 %s501_s12, 5  ;;  %s365_s22 = sshll.u32 %s501_s12, 6  ;;  %v361_v9 = vld [vmem:[%s494_s2] ss:$0 sm:$0xff] }
   0xe   : > { %s198_s19 = scalar_lea.vmem %s492_s0, %s364_s16  ;;  %s208_s27 = scalar_lea.vmem %s495_s3, %s365_s22 }
   0xf   : > { %v367_v1 = vld [vmem:[%s198_s19] sm:$0xff]   ;;  %v382_v2 = vld [vmem:[%s198_s19 + $0x8] sm:$0xff]   ;;  %v383_v3 = vld [vmem:[%s198_s19 + $0x10] sm:$0xff]  }
  0x10   : > { %v368_v4 = vunpack.c.l.bf16 %v367_v1  ;;  %v369_v5 = vunpack.c.h.bf16 %v367_v1  ;;  %v372_v6 = vunpack.c.l.bf16 %v382_v2  ;;  %v373_v7 = vunpack.c.h.bf16 %v382_v2  ;;  %v384_v8 = vld [vmem:[%s198_s19 + $0x18] sm:$0xff]  }
  0x11   : > { %v376_v10 = vunpack.c.l.bf16 %v383_v3  ;;  %v377_v11 = vunpack.c.h.bf16 %v383_v3  ;;  %v380_v12 = vunpack.c.l.bf16 %v384_v8  ;;  %v381_v13 = vunpack.c.h.bf16 %v384_v8 }
  0x12   : > { %v233_v14 = vmul.f32 %v368_v4, %v360_v0  ;;  %v234_v15 = vmul.f32 %v369_v5, %v360_v0  ;;  %v235_v16 = vmul.f32 %v372_v6, %v360_v0  ;;  %v236_v17 = vmul.f32 %v373_v7, %v360_v0 }
  0x13   : > { %v237_v18 = vmul.f32 %v376_v10, %v360_v0  ;;  %v238_v19 = vmul.f32 %v377_v11, %v360_v0  ;;  %v239_v20 = vmul.f32 %v380_v12, %v360_v0  ;;  %v240_v21 = vmul.f32 %v381_v13, %v360_v0 }
  0x14   : > { %v248_v22 = vadd.f32 %v361_v9, %v233_v14  ;;  %v249_v23 = vadd.f32 %v361_v9, %v234_v15  ;;  %v250_v24 = vadd.f32 %v361_v9, %v235_v16  ;;  %v251_v25 = vadd.f32 %v361_v9, %v236_v17 }
  0x15   : > { %v252_v26 = vadd.f32 %v361_v9, %v237_v18  ;;  %v253_v27 = vadd.f32 %v361_v9, %v238_v19  ;;  %v254_v28 = vadd.f32 %v361_v9, %v239_v20  ;;  %v255_v29 = vadd.f32 %v361_v9, %v240_v21 }
  0x16   : > { %256 = vst [vmem:[%s208_s27] sm:$0xff] %v248_v22  ;;  %257 = vst [vmem:[%s208_s27 + $0x8] sm:$0xff] %v249_v23 }
  0x17   : > { %258 = vst [vmem:[%s208_s27 + $0x10] sm:$0xff] %v250_v24  ;;  %259 = vst [vmem:[%s208_s27 + $0x18] sm:$0xff] %v251_v25 }
  0x18   : > { %260 = vst [vmem:[%s208_s27 + $0x20] sm:$0xff] %v252_v26  ;;  %261 = vst [vmem:[%s208_s27 + $0x28] sm:$0xff] %v253_v27 }
  0x19   : > { %262 = vst [vmem:[%s208_s27 + $0x30] sm:$0xff] %v254_v28  ;;  %263 = vst [vmem:[%s208_s27 + $0x38] sm:$0xff] %v255_v29 }
  0x1a PF: > { %s13_s14 = sadd.s32 1, %s431_s14   ;;  %s496_s12 = smov %s427_s13 }
  0x1b   : > { %p10_p5 = scmp.ge.s32.totalorder %s13_s14, 4   ;;  %s497_s13 = smov %s499_s15 }
  0x1d   :  { %12 = sbr.rel (!%p10_p5) target bundleno = 2 (0x2), region = 62 }

// kernel: conv_block_forward.2
= control target key start
LH: loop header
LB: loop body
LE: loop exit
PB: predicated region body
PF: predicated region fallthrough
CT: control target
= control target key end

     0   :  { %s1410_s18 = smov 0   ;;  %s1412_s19 = smov 0   ;;  %s1592_s0 = inlined_call_operand.vmem [shape: bf16[2,9,9,16], index: 0, kind: input, shape index: {}, may-alias: {0,1}]   ;;  %s1593_s1 = inlined_call_operand.vmem [shape: bf16[2,9,9,16], index: 1, kind: input, shape index: {}, may-alias: {0,1}]   ;;  %s1594_s2 = inlined_call_operand.vmem [shape: bf16[4,16,128], index: 2, kind: input, shape index: {}]   ;;  %s1595_s3 = inlined_call_operand.vmem [shape: f32[1,128], index: 3, kind: input, shape index: {}]   ;;  %s1596_s4 = inlined_call_operand.vmem [shape: bf16[2,8,8,128], index: 4, kind: output, shape index: {0}]   ;;  %s1597_s5 = inlined_call_operand.vmem [shape: f32[2,1,2,128], index: 5, kind: output, shape index: {1}]  }
   0x1   :  { %s1414_s20 = smov 0  }
   0x2 LB: > { %s28_s21 = sadd.s32 1, %s1374_s19  ;;  %p1188_p0 = scmp.ge.s32.totalorder %s1378_s20, 1  ;;  %s1378_s20 = sphi %s1414_s20, %s16_s20   ;;  %s1374_s19 = sphi %s1412_s19, %s1601_s19   ;;  %s1370_s18 = sphi %s1410_s18, %s1600_s18  }
   0x3   : > { %p30_p1 = scmp.ge.s32.totalorder %s28_s21, 2  ;;  %p248_p2 = scmp.lt.s32.totalorder %s1378_s20, 3 }
   0x5   : > { %s1603_s21 = smov (%p30_p1, %s28_s21), 0  ;;  %p249_p3 = pnand %p1188_p0, %p248_p2 }
   0x6   : > { %p314_p4 = scmp.lt.s32.totalorder (!%p249_p3), %s1370_s18, 1 }
   0x7   : > { %252 = sbr.rel (%p249_p3) target bundleno = 297 (0x129), region = 36 }
   0xc   : > { %v1352_v0 = vld [vmem:[%s1594_s2] sm:$0xff]   ;;  %v1353_v1 = vld [vmem:[%s1594_s2 + $0x8] sm:$0xff]   ;;  %s1605_s18 = smov (!%p314_p4, %s1370_s18), 1  ;;  %v1439_v2 = vld [vmem:[%s1594_s2 + $0x10] sm:$0xff]   ;;  %vm435_vm2 = vsmask.f32 3328 }
   0xd   : > { %1295 = vmatprep.subr.bf16.mxu1 %v1352_v0  ;;  %1285 = vmatprep.subr.bf16.mxu0 %v1353_v1  ;;  %s1325_s28 = smul.u32 72, %s1605_s18  ;;  %v1355_v3 = vld [vmem:[%s1594_s2 + $0x18] sm:$0xff]   ;;  %vm436_vm3 = vsmask.f32 7440  ;;  %vm571_vm6 = vcmask 130048   ;;  %s1241_s15 = sshll.u32 %s1605_s18, 5 }
   0xe   : > { %1296 = vmatpush3.bf16.msra.mxu1 %v1352_v0  ;;  %1286 = vmatpush3.bf16.msra.mxu0 %v1353_v1  ;;  %vm1481_vm13 = vmor %vm435_vm2, %vm436_vm3  ;;  %s1573_s22 = scalar_lea.vmem %s1596_s4, %s1241_s15  ;;  %s1193_s23 = sshll.u32 %s1605_s18, 1 }
   0xf   : > { %1305 = vmatprep.subr.bf16.mxu0 %v1439_v2  ;;  %s1451_s8 = scalar_lea.vmem %s1592_s0, %s1325_s28  ;;  %1315 = vmatprep.subr.bf16.mxu1 %v1355_v3  ;;  %s1240_s9 = sadd.s32 64, %s1325_s28 }
  0x10   : > { %v361_v4 = vld [vmem:[%s1451_s8] sm:$0xf]  ;;  %v363_v5 = vld [vmem:[%s1451_s8 + $0x8] sm:$0xf]  ;;  %v365_v6 = vld [vmem:[%s1451_s8 + $0x10] sm:$0xf]  ;;  %s339_s12 = scalar_lea.vmem %s1593_s1, %s1240_s9  ;;  %s358_s26 = scalar_lea.vmem %s1597_s5, %s1193_s23 }
  0x11   : > { %vm379_vm0 = vcmp.ge.bf16.partialorder %v361_v4, 0  ;;  %vm381_vm1 = vcmp.ge.bf16.partialorder %v363_v5, 0  ;;  %v397_v7 = vmul.bf16 1045249613, %v361_v4  ;;  %v399_v8 = vmul.bf16 1045249613, %v363_v5 }
  0x12   : > { %v367_v9 = vld [vmem:[%s1451_s8 + $0x18] sm:$0xf]  ;;  %vm383_vm4 = vcmp.ge.bf16.partialorder %v365_v6, 0  ;;  %v401_v10 = vmul.bf16 1045249613, %v365_v6 }
  0x13   : > { %v415_v11 = vsel %vm379_vm0, %v361_v4, %v397_v7  ;;  %v1457_v12 = vsel %vm381_vm1, %v363_v5, %v399_v8  ;;  %vm385_vm5 = vcmp.ge.bf16.partialorder %v367_v9, 0  ;;  %v403_v13 = vmul.bf16 1045249613, %v367_v9  ;;  %v362_v14 = vld [vmem:[%s1451_s8 + $0x4] sm:$0x1] }
  0x14   : > { %v439_v15 = vshrl.u32 %v415_v11, 16  ;;  %v442_v16 = vshll.u32 %v415_v11, 16  ;;  %v453_v17 = vshrl.u32 %v1457_v12, 16  ;;  %v364_v18 = vld [vmem:[%s1451_s8 + $0xc] sm:$0x1]  ;;  %v1205_v19 = vcombine.low %v415_v11, %v1457_v12 }
  0x15   : > { %v1463_v20 = vsel %vm383_vm4, %v365_v6, %v401_v10  ;;  %v1465_v21 = vsel %vm385_vm5, %v367_v9, %v403_v13  ;;  %v366_v22 = vld [vmem:[%s1451_s8 + $0x14] sm:$0x1]  ;;  %v368_v23 = vld [vmem:[%s1451_s8 + $0x1c] sm:$0x1]  ;;  %v369_v24 = vld [vmem:[%s1451_s8 + $0x20] sm:$0xf] }
  0x16   : > { %v441_v25 = vrot.slane %v439_v15, 4  ;;  %v444_v26 = vrot.slane %v442_v16, 5  ;;  %v456_v27 = vshll.u32 %v1457_v12, 16  ;;  %v1206_v28 = vcombine.low %v1463_v20, %v1465_v21  ;;  %1297 = vmatprep.mubr.msk.bf16.mxu1 %vm571_vm6, %v1205_v19  ;;  %v370_v29 = vld [vmem:[%s1451_s8 + $0x24] sm:$0x1] }
  0x17   : > { %vm380_vm7 = vcmp.ge.bf16.partialorder %v362_v14, 0  ;;  %vm382_vm8 = vcmp.ge.bf16.partialorder %v364_v18, 0  ;;  %vm384_vm9 = vcmp.ge.bf16.partialorder %v366_v22, 0  ;;  %vm386_vm10 = vcmp.ge.bf16.partialorder %v368_v23, 0  ;;  %v371_v0 = vld [vmem:[%s1451_s8 + $0x28] sm:$0xf] }
  0x18   : > { %1298 = vmatmul.mubr.msk.bf16.vlgmr.msra.gmra.mxu1 %vm571_vm6, %v1206_v28  ;;  %vm387_vm11 = vcmp.ge.bf16.partialorder %v369_v24, 0  ;;  %v398_v30 = vmul.bf16 1045249613, %v362_v14  ;;  %v400_v31 = vmul.bf16 1045249613, %v364_v18  ;;  %v445_v32 = vor.u32 %v444_v26, %v441_v25 }
  0x19   : > { %v402_v33 = vmul.bf16 1045249613, %v366_v22  ;;  %v404_v34 = vmul.bf16 1045249613, %v368_v23  ;;  %v405_v35 = vmul.bf16 1045249613, %v369_v24  ;;  %1316 = vmatpush3.bf16.msra.mxu1 %v1355_v3 }
  0x1a   : > { %vm388_vm12 = vcmp.ge.bf16.partialorder %v370_v29, 0  ;;  %v406_v36 = vmul.bf16 1045249613, %v370_v29  ;;  %v416_v37 = vsel %vm380_vm7, %v362_v14, %v398_v30  ;;  %v418_v38 = vsel %vm382_vm8, %v364_v18, %v400_v31  ;;  %v373_v6 = vld [vmem:[%s1451_s8 + $0x30] sm:$0xf] }
  0x1b   : > { %v420_v39 = vsel %vm384_vm9, %v366_v22, %v402_v33  ;;  %v422_v40 = vsel %vm386_vm10, %v368_v23, %v404_v34  ;;  %v446_v41 = vrot.slane %v445_v32, 4  ;;  %v448_v42 = vshll.u32 %v416_v37, 16  ;;  %v375_v11 = vld [vmem:[%s1451_s8 + $0x38] sm:$0xf]  ;;  %v372_v28 = vld [vmem:[%s1451_s8 + $0x2c] sm:$0x1] }
  0x1c   : > { %v1477_v43 = vsel %vm387_vm11, %v369_v24, %v405_v35  ;;  %v455_v45 = vrot.slane %v453_v17, 4  ;;  %v458_v46 = vrot.slane %v456_v27, 5  ;;  %v462_v47 = vshll.u32 %v418_v38, 16  ;;  %v374_v37 = vld [vmem:[%s1451_s8 + $0x34] sm:$0x1] }
  0x1d   : > { %v450_v48 = vrot.slane %v448_v42, 5  ;;  %v467_v49 = vshrl.u32 %v1463_v20, 16  ;;  %v470_v50 = vshll.u32 %v1463_v20, 16  ;;  %v476_v51 = vshll.u32 %v420_v39, 16  ;;  %v376_v38 = vld [vmem:[%s1451_s8 + $0x3c] sm:$0x1] }
  0x1e   : > { %v459_v52 = vor.u32 %v458_v46, %v455_v45  ;;  %v464_v53 = vrot.slane %v462_v47, 5  ;;  %v481_v54 = vshrl.u32 %v1465_v21, 16  ;;  %v484_v55 = vshll.u32 %v1465_v21, 16 }
  0x1f   : > { %v424_v56 = vsel %vm388_vm12, %v370_v29, %v406_v36  ;;  %v451_v57 = vsel %vm1481_vm13, %v446_v41, %v450_v48  ;;  %v469_v58 = vrot.slane %v467_v49, 4  ;;  %v472_v59 = vrot.slane %v470_v50, 5  ;;  %v377_v50 = vld [vmem:[%s339_s12] sm:$0xf] }
  0x20   : > { %v460_v60 = vrot.slane %v459_v52, 4  ;;  %v483_v61 = vrot.slane %v481_v54, 4  ;;  %v486_v62 = vrot.slane %v484_v55, 5  ;;  %v490_v63 = vshll.u32 %v422_v40, 16 }
  0x21   : > { %v473_v1 = vor.u32 %v472_v59, %v469_v58  ;;  %v478_v3 = vrot.slane %v476_v51, 5  ;;  %v495_v4 = vshrl.u32 %v1477_v43, 16  ;;  %v498_v5 = vshll.u32 %v1477_v43, 16  ;;  %v378_v58 = vld [vmem:[%s339_s12 + $0x4] sm:$0x1] }
  0x22   : > { %v465_v7 = vsel %vm1481_vm13, %v460_v60, %v464_v53  ;;  %v487_v8 = vor.u32 %v486_v62, %v483_v61  ;;  %v492_v9 = vrot.slane %v490_v63, 5  ;;  %v504_v10 = vshll.u32 %v424_v56, 16 }
  0x23   : > { %v474_v13 = vrot.slane %v473_v1, 4  ;;  %v497_v14 = vrot.slane %v495_v4, 4  ;;  %v500_v15 = vrot.slane %v498_v5, 5  ;;  %vm389_vm14 = vcmp.ge.bf16.partialorder %v371_v0, 0 }
  0x24   : > { %v488_v16 = vrot.slane %v487_v8, 4  ;;  %v1196_v17 = vcombine.low %v451_v57, %v465_v7  ;;  %v407_v18 = vmul.bf16 1045249613, %v371_v0  ;;  %vm391_vm15 = vcmp.ge.bf16.partialorder %v373_v6, 0 }
  0x25   : > { %v479_v19 = vsel %vm1481_vm13, %v474_v13, %v478_v3  ;;  %v501_v22 = vor.u32 %v500_v15, %v497_v14  ;;  %vm393_vm0 = vcmp.ge.bf16.partialorder %v375_v11, 0  ;;  %v409_v23 = vmul.bf16 1045249613, %v373_v6 }
  0x26   : > { %v1505_v24 = vsel %vm1481_vm13, %v488_v16, %v492_v9  ;;  %v506_v25 = vrot.slane %v504_v10, 5  ;;  %1287 = vmatprep.mubr.msk.bf16.mxu0 %vm571_vm6, %v1196_v17  ;;  %v1508_v26 = vsel %vm389_vm14, %v371_v0, %v407_v18  ;;  %v411_v27 = vmul.bf16 1045249613, %v375_v11 }
  0x27   : > { %v502_v29 = vrot.slane %v501_v22, 4  ;;  %v1197_v30 = vcombine.low %v479_v19, %v1505_v24  ;;  %v509_v31 = vshrl.u32 %v1508_v26, 16  ;;  %v512_v32 = vshll.u32 %v1508_v26, 16 }
  0x28   : > { %v1227_v33 = vcombine.low %v465_v7, %v479_v19  ;;  %v1207_v34 = vcombine.low %v1477_v43, %v1508_v26  ;;  %v1517_v35 = vsel %vm391_vm15, %v373_v6, %v409_v23  ;;  %v1520_v36 = vsel %vm393_vm0, %v375_v11, %v411_v27 }
  0x29   : > { %1288 = vmatmul.mubr.msk.bf16.vlgmr.msra.gmra.mxu0 %vm571_vm6, %v1197_v30  ;;  %v523_v39 = vshrl.u32 %v1517_v35, 16  ;;  %v526_v40 = vshll.u32 %v1517_v35, 16  ;;  %v537_v41 = vshrl.u32 %v1520_v36, 16  ;;  %vm390_vm1 = vcmp.ge.bf16.partialorder %v372_v28, 0 }
  0x2a   : > { %v507_v42 = vsel %vm1481_vm13, %v502_v29, %v506_v25  ;;  %1306 = vmatpush3.bf16.msra.mxu0 %v1439_v2  ;;  %1301 = vmatprep.mubr.msk.bf16.mxu1 %vm571_vm6, %v1207_v34  ;;  %v540_v45 = vshll.u32 %v1520_v36, 16  ;;  %v1208_v46 = vcombine.low %v1517_v35, %v1520_v36  ;;  %v408_v47 = vmul.bf16 1045249613, %v372_v28 }
  0x2b   : > { %v511_v48 = vrot.slane %v509_v31, 4  ;;  %v514_v49 = vrot.slane %v512_v32, 5  ;;  %vm392_vm2 = vcmp.ge.bf16.partialorder %v374_v37, 0  ;;  %vm394_vm3 = vcmp.ge.bf16.partialorder %v376_v38, 0 }
  0x2c   : > { %1302 = vmatmul.mubr.msk.bf16.gmra.mxu1 %vm571_vm6, %v1208_v46  ;;  %v426_v51 = vsel %vm390_vm1, %v372_v28, %v408_v47  ;;  %v410_v52 = vmul.bf16 1045249613, %v374_v37  ;;  %v412_v53 = vmul.bf16 1045249613, %v376_v38  ;;  %v525_v54 = vrot.slane %v523_v39, 4 }
  0x2d   : > { %v515_v2 = vor.u32 %v514_v49, %v511_v48  ;;  %v518_v55 = vshll.u32 %v426_v51, 16  ;;  %v528_v56 = vrot.slane %v526_v40, 5  ;;  %v539_v57 = vrot.slane %v537_v41, 4  ;;  %1317 = vmatprep.mubr.msk.bf16.mxu1 %vm571_vm6, %v1227_v33 }
  0x2e   : > { %v1228_v59 = vcombine.low %v1505_v24, %v507_v42  ;;  %v428_v60 = vsel %vm392_vm2, %v374_v37, %v410_v52  ;;  %v430_v61 = vsel %vm394_vm3, %v376_v38, %v412_v53  ;;  %v542_v62 = vrot.slane %v540_v45, 5 }
  0x2f   : > { %v516_v63 = vrot.slane %v515_v2, 4  ;;  %v520_v0 = vrot.slane %v518_v55, 5  ;;  %v529_v1 = vor.u32 %v528_v56, %v525_v54  ;;  %v532_v3 = vshll.u32 %v428_v60, 16 }
  0x30   : > { %v543_v4 = vor.u32 %v542_v62, %v539_v57  ;;  %v546_v5 = vshll.u32 %v430_v61, 16  ;;  %vm395_vm4 = vcmp.ge.bf16.partialorder %v377_v50, 0  ;;  %vm396_vm5 = vcmp.ge.bf16.partialorder %v378_v58, 0 }
  0x31   : > { %v521_v6 = vsel %vm1481_vm13, %v516_v63, %v520_v0  ;;  %v530_v7 = vrot.slane %v529_v1, 4  ;;  %v534_v8 = vrot.slane %v532_v3, 5  ;;  %v413_v9 = vmul.bf16 1045249613, %v377_v50  ;;  %v1236_v3 = vld [vmem:[%s1595_s3] ss:$0 sm:$0xff] }
  0x32   : > { %v1198_v10 = vcombine.low %v507_v42, %v521_v6  ;;  %v544_v11 = vrot.slane %v543_v4, 4  ;;  %v548_v13 = vrot.slane %v546_v5, 5  ;;  %v414_v14 = vmul.bf16 1045249613, %v378_v58 }
  0x33   : > { %v535_v15 = vsel %vm1481_vm13, %v530_v7, %v534_v8  ;;  %v1216_v16 = vcombine.low %v1457_v12, %v1463_v20  ;;  %v431_v17 = vsel %vm395_vm4, %v377_v50, %v413_v9  ;;  %v1217_v30 = vcombine.low %v1465_v21, %v1477_v43 }
  0x34   : > { %1291 = vmatprep.mubr.msk.bf16.mxu0 %vm571_vm6, %v1198_v10  ;;  %v549_v18 = vsel %vm1481_vm13, %v544_v11, %v548_v13  ;;  %1318 = vmatmul.mubr.msk.bf16.vlgmr.msra.gmra.mxu1 %vm571_vm6, %v1228_v59  ;;  %v1229_v19 = vcombine.low %v521_v6, %v535_v15  ;;  %v432_v22 = vsel %vm396_vm5, %v378_v58, %v414_v14  ;;  %v853_v23 = vshrl.u32 %v431_v17, 16 }
  0x35   : > { %v1199_v24 = vcombine.low %v535_v15, %v549_v18  ;;  %v856_v25 = vshll.u32 %v431_v17, 16  ;;  %v862_v27 = vshll.u32 %v432_v22, 16  ;;  %v1218_v32 = vcombine.low %v1508_v26, %v1517_v35 }
  0x36   : > { %1321 = vmatprep.mubr.msk.bf16.mxu1 %vm571_vm6, %v1229_v19  ;;  %v855_v28 = vrot.slane %v853_v23, 4  ;;  %v1219_v37 = vcombine.low %v1520_v36, %v431_v17 }
  0x37   : > { %1292 = vmatmul.mubr.msk.bf16.gmra.mxu0 %vm571_vm6, %v1199_v24  ;;  %v858_v12 = vrot.slane %v856_v25, 5  ;;  %v864_v29 = vrot.slane %v862_v27, 5 }
  0x38   : > { %1307 = vmatprep.mubr.msk.bf16.mxu0 %vm571_vm6, %v1216_v16 }
  0x39   : > { %v859_v20 = vor.u32 %v858_v12, %v855_v28 }
  0x3b   : > { %v860_v31 = vrot.slane %v859_v20, 4 }
  0x3d   : > { %v865_v33 = vsel %vm1481_vm13, %v860_v31, %v864_v29 }
  0x3e   : > { %v1230_v34 = vcombine.low %v549_v18, %v865_v33 }
  0x3f   : > { %1308 = vmatmul.mubr.msk.bf16.vlgmr.msra.gmra.mxu0 %vm571_vm6, %v1217_v30 }
  0x40   : > { %1322 = vmatmul.mubr.msk.bf16.gmra.mxu1 %vm571_vm6, %v1230_v34  ;;  %1311 = vmatprep.mubr.msk.bf16.mxu0 %vm571_vm6, %v1218_v32 }
  0x47   : > { %1312 = vmatmul.mubr.msk.bf16.gmra.mxu0 %vm571_vm6, %v1219_v37 }
  0xd8   : > { %v1299_v38 = vpop.f32.mrf.mxu1 }
  0xda   : > { %v721_v21 = vpop.f32.mrf.mxu1 }
  0xdc   : > { %v1300_v43 = vpop.f32.mrf.mxu1 }
  0xde   : > { %v724_v39 = vpop.f32.mrf.mxu1 }
  0xe9   : > { %v1289_v40 = vpop.f32.mrf.mxu0 }
  0xea   : > { %v730_v53 = vadd.f32 %v1299_v38, %v1289_v40 }
  0xeb   : > { %v618_v26 = vpop.f32.mrf.mxu0 }
  0xec   : > { %v1303_v35 = vpop.f32.mrf.mxu1  ;;  %v722_v55 = vadd.f32 %v721_v21, %v618_v26 }
  0xed   : > { %v1290_v41 = vpop.f32.mrf.mxu0 }
  0xee   : > { %v737_v44 = vpop.f32.mrf.mxu1  ;;  %v733_v58 = vadd.f32 %v1300_v43, %v1290_v41 }
  0xef   : > { %v621_v46 = vpop.f32.mrf.mxu0 }
  0xf0   : > { %v1304_v42 = vpop.f32.mrf.mxu1  ;;  %v725_v62 = vadd.f32 %v724_v39, %v621_v46 }
  0xf2   : > { %v740_v45 = vpop.f32.mrf.mxu1 }
  0xf4   : > { %v1319_v47 = vpop.f32.mrf.mxu1 }
  0xf6   : > { %v926_v49 = vpop.f32.mrf.mxu1 }
  0xf7   : > { %v1293_v48 = vpop.f32.mrf.mxu0 }
  0xf8   : > { %v1320_v36 = vpop.f32.mrf.mxu1  ;;  %v746_v7 = vadd.f32 %v1303_v35, %v1293_v48 }
  0xf9   : > { %v634_v50 = vpop.f32.mrf.mxu0 }
  0xfa   : > { %v929_v2 = vpop.f32.mrf.mxu1  ;;  %v738_v15 = vadd.f32 %v737_v44, %v634_v50 }
  0xfb   : > { %v1294_v51 = vpop.f32.mrf.mxu0 }
  0xfc   : > { %v749_v22 = vadd.f32 %v1304_v42, %v1294_v51 }
  0xfd   : > { %v637_v52 = vpop.f32.mrf.mxu0 }
  0xfe   : > { %v741_v23 = vadd.f32 %v740_v45, %v637_v52 }
  0xff   : > { %v1309_v54 = vpop.f32.mrf.mxu0 }
 0x100   : > { %v846_v56 = vadd.f32 %v1309_v54, %v730_v53  ;;  %v1323_v61 = vpop.f32.mrf.mxu1 }
 0x101   : > { %v813_v57 = vpop.f32.mrf.mxu0 }
 0x102   : > { %v844_v59 = vadd.f32 %v813_v57, %v722_v55  ;;  %v959_v63 = vadd.f32 %v1319_v47, %v846_v56  ;;  %v942_v8 = vpop.f32.mrf.mxu1 }
 0x103   : > { %v1310_v60 = vpop.f32.mrf.mxu0 }
 0x104   : > { %v957_v0 = vadd.f32 %v926_v49, %v844_v59  ;;  %v847_v1 = vadd.f32 %v1310_v60, %v733_v58  ;;  %v974_v10 = vadd.f32 %v1236_v3, %v959_v63  ;;  %v1324_v24 = vpop.f32.mrf.mxu1 }
 0x105   : > { %v816_v4 = vpop.f32.mrf.mxu0 }
 0x106   : > { %v960_v5 = vadd.f32 %v1320_v36, %v847_v1  ;;  %v845_v6 = vadd.f32 %v816_v4, %v725_v62  ;;  %v972_v11 = vadd.f32 %v1236_v3, %v957_v0  ;;  %v1012_v34 = vmul.f32 %v974_v10, %v974_v10  ;;  %v945_v39 = vpop.f32.mrf.mxu1 }
 0x107   : > { %v1313_v9 = vpop.f32.mrf.mxu0 }
 0x108   : > { %v975_v13 = vadd.f32 %v1236_v3, %v960_v5  ;;  %v958_v14 = vadd.f32 %v929_v2, %v845_v6  ;;  %v850_v16 = vadd.f32 %v1313_v9, %v746_v7  ;;  %v1010_v28 = vmul.f32 %v972_v11, %v972_v11 }
 0x109   : > { %v829_v17 = vpop.f32.mrf.mxu0 }
 0x10a   : > { %v1250_v18 = vpack.c.bf16 %v975_v13, %v974_v10  ;;  %v973_v19 = vadd.f32 %v1236_v3, %v958_v14  ;;  %v848_v25 = vadd.f32 %v829_v17, %v738_v15  ;;  %v963_v30 = vadd.f32 %v1323_v61, %v850_v16 }
 0x10b   : > { %v1314_v27 = vpop.f32.mrf.mxu0  ;;  %v1013_v26 = vmul.f32 %v975_v13, %v975_v13 }
 0x10c   : > { %1262 = vst [vmem:[%s1573_s22 + $0x8] sm:$0xff] %v1250_v18   ;;  %v1245_v12 = vpack.c.bf16 %v973_v19, %v972_v11  ;;  %v996_v20 = vadd.f32 %v973_v19, %v972_v11  ;;  %v1011_v29 = vmul.f32 %v973_v19, %v973_v19  ;;  %v961_v31 = vadd.f32 %v942_v8, %v848_v25 }
 0x10d   : > { %v851_v32 = vadd.f32 %v1314_v27, %v749_v22  ;;  %v832_v33 = vpop.f32.mrf.mxu0  ;;  %v978_v42 = vadd.f32 %v1236_v3, %v963_v30 }
 0x10e   : > { %1246 = vst [vmem:[%s1573_s22] sm:$0xff] %v1245_v12   ;;  %v997_v37 = vadd.f32 %v996_v20, %v974_v10  ;;  %v1018_v38 = vadd.f32 %v1011_v29, %v1010_v28  ;;  %v849_v21 = vadd.f32 %v832_v33, %v741_v23  ;;  %v976_v43 = vadd.f32 %v1236_v3, %v961_v31 }
 0x10f   : > { %v964_v40 = vadd.f32 %v1324_v24, %v851_v32  ;;  %v1016_v54 = vmul.f32 %v978_v42, %v978_v42 }
 0x110   : > { %v1019_v35 = vadd.f32 %v1018_v38, %v1012_v34  ;;  %v998_v44 = vadd.f32 %v997_v37, %v975_v13  ;;  %v962_v41 = vadd.f32 %v945_v39, %v849_v21  ;;  %v1014_v47 = vmul.f32 %v976_v43, %v976_v43 }
 0x111   : > { %v979_v45 = vadd.f32 %v1236_v3, %v964_v40 }
 0x112   : > { %v999_v46 = vadd.f32 %v998_v44, %v976_v43  ;;  %v1020_v48 = vadd.f32 %v1019_v35, %v1013_v26  ;;  %v977_v49 = vadd.f32 %v1236_v3, %v962_v41 }
 0x113   : > { %v1260_v50 = vpack.c.bf16 %v979_v45, %v978_v42  ;;  %v1017_v56 = vmul.f32 %v979_v45, %v979_v45 }
 0x114   : > { %v1021_v51 = vadd.f32 %v1020_v48, %v1014_v47  ;;  %v1255_v36 = vpack.c.bf16 %v977_v49, %v976_v43  ;;  %v1000_v52 = vadd.f32 %v999_v46, %v977_v49  ;;  %v1015_v53 = vmul.f32 %v977_v49, %v977_v49 }
 0x115   : > { %1264 = vst [vmem:[%s1573_s22 + $0x18] sm:$0xff] %v1260_v50  }
 0x116   : > { %1263 = vst [vmem:[%s1573_s22 + $0x10] sm:$0xff] %v1255_v36   ;;  %v1001_v2 = vadd.f32 %v1000_v52, %v978_v42  ;;  %v1022_v55 = vadd.f32 %v1021_v51, %v1015_v53 }
 0x118   : > { %v1002_v57 = vadd.f32 %v1001_v2, %v979_v45  ;;  %v1023_v58 = vadd.f32 %v1022_v55, %v1016_v54 }
 0x11a   : > { %v1003_v59 = vrot.slane %v1002_v57, 4  ;;  %v1024_v60 = vadd.f32 %v1023_v58, %v1017_v56 }
 0x11c   : > { %v1004_v61 = vadd.f32 %v1003_v59, %v1002_v57  ;;  %v1025_v62 = vrot.slane %v1024_v60, 4 }
 0x11e   : > { %v1005_v63 = vrot.slane %v1004_v61, 2  ;;  %v1026_v0 = vadd.f32 %v1025_v62, %v1024_v60 }
 0x120   : > { %v1006_v1 = vadd.f32 %v1005_v63, %v1004_v61  ;;  %v1027_v3 = vrot.slane %v1026_v0, 2 }
 0x122   : > { %v1007_v4 = vrot.slane %v1006_v1, 1  ;;  %v1028_v5 = vadd.f32 %v1027_v3, %v1026_v0 }
 0x124   : > { %v1008_v6 = vadd.f32 %v1007_v4, %v1006_v1  ;;  %v1029_v7 = vrot.slane %v1028_v5, 1 }
 0x126   : > { %1009 = vst [vmem:[%s358_s26] sm:$0x1] %v1008_v6  ;;  %v1030_v8 = vadd.f32 %v1029_v7, %v1028_v5 }
 0x128   : > { %1031 = vst [vmem:[%s358_s26 + $0x1] sm:$0x1] %v1030_v8 }
 0x129 PF: > { %s16_s20 = sadd.s32 1, %s1378_s20   ;;  %s1600_s18 = smov %s1374_s19 }
 0x12a   : > { %p13_p5 = scmp.ge.s32.totalorder %s16_s20, 4   ;;  %s1601_s19 = smov %s1603_s21 }
 0x12c   :  { %15 = sbr.rel (!%p13_p5) target bundleno = 2 (0x2), region = 84 }

</bundles_post_ra>
